<compile_context>
chip_gen: v7x
topology: tpu7x:2x2x1
jax: 0.10.0
libtpu: 0.0.40
codegen_flags: <defaults>
</compile_context>

<pallas_src>
import jax
import jax.numpy as jnp
from jax.experimental import pallas as pl
from jax.experimental.pallas import tpu as pltpu


def _round_up(x, m):
    return (x + m - 1) // m * m


def _cdiv(a, b):
    return (a + b - 1) // b


def conv_bn_silu_kernel(x_ref, w_ref, b_ref, o_ref):
    # x_ref: (Cin, tl)  channels on sublanes, spatial positions on lanes
    # w_ref: (tc, Cin)  1x1-conv weight with the BN scale folded in
    # b_ref: (tc, 1)    folded BN bias (f32), broadcast over the lane axis
    # o_ref: (tc, tl)
    y = jnp.dot(w_ref[...], x_ref[...], preferred_element_type=jnp.float32)
    y = y + b_ref[...]
    # SiLU: y * sigmoid(y).  exp runs on the EUP; exact reciprocal keeps
    # bit-accuracy (swap in pl.reciprocal(..., approx=True) if VALU-bound).
    o_ref[...] = (y * (1.0 / (1.0 + jnp.exp(-y)))).astype(o_ref.dtype)


def _vmem_capacity_bytes():
    try:
        info = pltpu.get_tpu_info()
        for attr in ("vmem_capacity_bytes", "vmem_size_bytes", "vmem_bytes"):
            v = getattr(info, attr, None)
            if v:
                return int(v)
    except Exception:
        pass
    return 64 * 1024 * 1024  # conservative fallback (v7x-sized VMEM)


def _mxu_tile():
    try:
        kind = jax.devices()[0].device_kind.lower()
    except Exception:
        kind = ""
    small = any(t in kind for t in ("v2", "v3", "v4", "v5 lite", "v5lite", "v5e"))
    return 128 if small else 256


def conv_bn_silu(x_nchw, conv_w, gamma, beta, running_mean, running_var, eps=1e-5):
    """Fused 1x1 Conv + BatchNorm(eval) + SiLU.

    x_nchw: (N, Cin, H, W); conv_w: (Cout, Cin, 1, 1). Returns (N, Cout, H, W).
    """
    N, Cin, H, W = x_nchw.shape
    Cout = conv_w.shape[0]
    HW = H * W
    itm = jnp.dtype(x_nchw.dtype).itemsize

    # ---- fold BatchNorm (inference semantics) in float32 -------------------
    g32 = gamma.astype(jnp.float32)
    b32 = beta.astype(jnp.float32)
    m32 = running_mean.astype(jnp.float32)
    v32 = running_var.astype(jnp.float32)
    scale = g32 * jax.lax.rsqrt(v32 + eps)                    # (Cout,)
    w2d = conv_w.reshape(Cout, Cin).astype(jnp.float32)
    w_scaled = (w2d * scale[:, None]).astype(x_nchw.dtype)    # (Cout, Cin)
    bias = (b32 - m32 * scale).reshape(Cout, 1)               # (Cout, 1), f32

    # (N, Cin, H, W) -> (N, Cin, H*W): free reshape; NO pad / slice / transpose.
    x3d = x_nchw.reshape(N, Cin, HW)

    # ---- tiling -------------------------------------------------------------
    mxu = _mxu_tile()
    tc = Cout if Cout < 512 else mxu            # Cout tile (large layers only)
    n_c = _cdiv(Cout, tc)

    # Spatial (lane) tile: >= ~1 MiB of x+out traffic per grid step.
    tl = _round_up(max(1, (1 << 20) // max(1, (Cin + Cout) * itm)), 128)
    tl = max(128, min(tl, _round_up(HW, 128)))

    vmem_cap = _vmem_capacity_bytes()
    vmem_budget = min(int(vmem_cap * 3 // 4), 100 * 1024 * 1024)

    def est_bytes(tl_):
        x_b = 2 * _round_up(Cin, 8) * tl_ * itm                        # dbl-buf x
        o_b = 2 * _round_up(tc, 8) * tl_ * itm                         # dbl-buf out
        w_b = (1 if n_c == 1 else 2) * _round_up(tc, 8) * _round_up(Cin, 128) * itm
        b_b = 2 * _round_up(tc, 8) * 128 * 4                           # lane-padded bias
        st_b = 2 * _round_up(tc, 8) * tl_ * 4                          # f32 staging of y
        return x_b + o_b + w_b + b_b + st_b

    while est_bytes(tl) > vmem_budget and tl > 128:
        tl = max(128, _round_up(tl // 2, 128))

    # v7x: two TensorCores share 'parallel' grid axes -> ensure >= 2 grid steps.
    if N * n_c * _cdiv(HW, tl) < 2 and HW > 128:
        tl = max(128, _round_up(_cdiv(HW, 2), 128))
    n_sp = _cdiv(HW, tl)

    vmem_limit = int(min(max(2 * est_bytes(tl), 32 * 1024 * 1024), vmem_budget))

    def build(const_pipeline_mode):
        kw = {} if const_pipeline_mode is None else {"pipeline_mode": const_pipeline_mode}
        grid_spec = pltpu.PrefetchScalarGridSpec(
            num_scalar_prefetch=0,
            grid=(N, n_c, n_sp),
            in_specs=[
                # leading size-1 batch dim squeezed -> kernel ref is (Cin, tl)
                pl.BlockSpec((None, Cin, tl), lambda n, c, j: (n, 0, j)),
                pl.BlockSpec((tc, Cin), lambda n, c, j: (c, 0), **kw),
                pl.BlockSpec((tc, 1), lambda n, c, j: (c, 0), **kw),
            ],
            out_specs=pl.BlockSpec((None, tc, tl), lambda n, c, j: (n, c, j)),
        )
        return pl.pallas_call(
            conv_bn_silu_kernel,
            out_shape=jax.ShapeDtypeStruct((N, Cout, HW), x_nchw.dtype),
            grid_spec=grid_spec,
            compiler_params=pltpu.CompilerParams(
                dimension_semantics=("parallel", "parallel", "parallel"),
                vmem_limit_bytes=vmem_limit),
        )

    try:
        # Weight/bias index maps are grid-constant when Cout is not tiled:
        # single-buffer them (removes the dead second VMEM copy of the weight).
        mode = pl.Buffered(1) if n_c == 1 else None
        y3d = build(mode)(x3d, w_scaled, bias)
    except Exception:
        y3d = build(None)(x3d, w_scaled, bias)   # fallback: default buffering

    return y3d.reshape(N, Cout, H, W)


if __name__ == "__main__":
    key = jax.random.PRNGKey(0)
    k1, k2, k3, k4, k5, k6 = jax.random.split(key, 6)

    N, Cin, H, W = 2, 4, 16, 16
    Cout = 8

    x = jax.random.normal(k1, (N, Cin, H, W), dtype=jnp.float32)
    conv_w = jax.random.normal(k2, (Cout, Cin, 1, 1), dtype=jnp.float32) * 0.1
    gamma = jax.random.normal(k3, (Cout,), dtype=jnp.float32) * 0.1 + 1.0
    beta = jax.random.normal(k4, (Cout,), dtype=jnp.float32) * 0.1
    running_mean = jax.random.normal(k5, (Cout,), dtype=jnp.float32) * 0.1
    running_var = jnp.abs(jax.random.normal(k6, (Cout,), dtype=jnp.float32)) * 0.1 + 1.0

    out = conv_bn_silu(x, conv_w, gamma, beta, running_mean, running_var)
    out = jax.block_until_ready(out)

    # Exact-f32 elementwise reference (1x1 conv == channel contraction),
    # eval-mode BN, then SiLU -- mirrors the PyTorch module's forward.
    eps = 1e-5
    w2 = conv_w.reshape(Cout, Cin)
    y_lin = (x[:, None, :, :, :] * w2[None, :, :, None, None]).sum(axis=2)
    s = (gamma / jnp.sqrt(running_var + eps)).reshape(1, Cout, 1, 1)
    b = (beta - running_mean * gamma / jnp.sqrt(running_var + eps)).reshape(1, Cout, 1, 1)
    y_ref = y_lin * s + b
    y_ref = y_ref * jax.nn.sigmoid(y_ref)

    assert out.shape == (N, Cout, H, W)
    # Tolerance covers a possible bf16-pass MXU f32 matmul; real structural
    # errors (missing BN/bias/SiLU, transposed weight) are orders larger.
    assert jnp.allclose(out, y_ref, atol=5e-3, rtol=5e-3), "mismatch vs reference"

    print("KERNEL_OK")
</pallas_src>

<mosaic_0001>
module attributes {stable_mosaic.version = 11 : i64} {
  func.func @conv_bn_silu_kernel(%arg0: i32, %arg1: i32, %arg2: i32, %arg3: memref<1x4x256xf32, #tpu.memory_space<vmem>>, %arg4: memref<8x4xf32, #tpu.memory_space<vmem>>, %arg5: memref<8x1xf32, #tpu.memory_space<vmem>>, %arg6: memref<1x8x256xf32, #tpu.memory_space<vmem>>) attributes {dimension_semantics = [#tpu.dimension_semantics<parallel>, #tpu.dimension_semantics<parallel>, #tpu.dimension_semantics<parallel>], iteration_bounds = array<i64: 2, 1, 1>, scalar_prefetch = 0 : i64, scratch_operands = 0 : i64, tpu.core_type = #tpu.core_type<tc>, window_params = [{transform_indices = @transform_0, window_bounds = array<i64: 1, 4, 256>}, {pipeline_mode = #tpu.pipeline_mode<synchronous>, transform_indices = @transform_1, window_bounds = array<i64: 8, 4>}, {pipeline_mode = #tpu.pipeline_mode<synchronous>, transform_indices = @transform_2, window_bounds = array<i64: 8, 1>}, {transform_indices = @transform_3, window_bounds = array<i64: 1, 8, 256>}]} {
    %c0 = arith.constant 0 : index
    %c0_0 = arith.constant 0 : index
    %0 = vector.load %arg4[%c0, %c0_0] : memref<8x4xf32, #tpu.memory_space<vmem>>, vector<8x4xf32>
    %c0_1 = arith.constant 0 : index
    %c0_2 = arith.constant 0 : index
    %c0_3 = arith.constant 0 : index
    %1 = vector.load %arg3[%c0_1, %c0_2, %c0_3] : memref<1x4x256xf32, #tpu.memory_space<vmem>>, vector<1x4x256xf32>
    %2 = vector.shape_cast %1 : vector<1x4x256xf32> to vector<4x256xf32>
    %cst = arith.constant dense<0.000000e+00> : vector<8x256xf32>
    %3 = tpu.matmul %0, %2, %cst {dimension_numbers = #tpu.dot_dimension_numbers<[1], [0], [0], [1], [0, 0, 1, 1], [], []>} : vector<8x4xf32>, vector<4x256xf32>, vector<8x256xf32> -> vector<8x256xf32>
    %c0_4 = arith.constant 0 : index
    %c0_5 = arith.constant 0 : index
    %4 = vector.load %arg5[%c0_4, %c0_5] : memref<8x1xf32, #tpu.memory_space<vmem>>, vector<8x1xf32>
    %5 = vector.broadcast %4 : vector<8x1xf32> to vector<8x256xf32>
    %6 = arith.addf %3, %5 : vector<8x256xf32>
    %cst_6 = arith.constant 0.000000e+00 : f32
    %7 = vector.broadcast %cst_6 : f32 to vector<8x256xf32>
    %8 = arith.subf %7, %6 : vector<8x256xf32>
    %9 = math.exp %8 : vector<8x256xf32>
    %cst_7 = arith.constant 1.000000e+00 : f32
    %10 = vector.broadcast %cst_7 : f32 to vector<8x256xf32>
    %11 = arith.addf %10, %9 : vector<8x256xf32>
    %cst_8 = arith.constant 1.000000e+00 : f32
    %12 = vector.broadcast %cst_8 : f32 to vector<8x256xf32>
    %13 = arith.divf %12, %11 : vector<8x256xf32>
    %14 = arith.mulf %6, %13 : vector<8x256xf32>
    %c0_9 = arith.constant 0 : index
    %c0_10 = arith.constant 0 : index
    %c0_11 = arith.constant 0 : index
    %15 = vector.load %arg6[%c0_9, %c0_10, %c0_11] : memref<1x8x256xf32, #tpu.memory_space<vmem>>, vector<1x8x256xf32>
    %16 = vector.shape_cast %15 : vector<1x8x256xf32> to vector<8x256xf32>
    %17 = vector.shape_cast %14 : vector<8x256xf32> to vector<1x8x256xf32>
    tpu.vector_store %arg6[%c0_9, %c0_10, %c0_11], %17 {strides = array<i32>} : memref<1x8x256xf32, #tpu.memory_space<vmem>>, vector<1x8x256xf32>,
    return
  }
  func.func @transform_0(%arg0: i32, %arg1: i32, %arg2: i32) -> (i32, i32, i32) {
    %c0_i32 = arith.constant 0 : i32
    %c0_i32_0 = arith.constant 0 : i32
    return %arg0, %c0_i32, %arg2 : i32, i32, i32
  }
  func.func @transform_1(%arg0: i32, %arg1: i32, %arg2: i32) -> (i32, i32) {
    %c0_i32 = arith.constant 0 : i32
    %c0_i32_0 = arith.constant 0 : i32
    return %arg1, %c0_i32 : i32, i32
  }
  func.func @transform_2(%arg0: i32, %arg1: i32, %arg2: i32) -> (i32, i32) {
    %c0_i32 = arith.constant 0 : i32
    %c0_i32_0 = arith.constant 0 : i32
    return %arg1, %c0_i32 : i32, i32
  }
  func.func @transform_3(%arg0: i32, %arg1: i32, %arg2: i32) -> (i32, i32, i32) {
    %c0_i32 = arith.constant 0 : i32
    return %arg0, %arg1, %arg2 : i32, i32, i32
  }
}

module attributes {stable_mosaic.version = 11 : i64} {
  func.func @conv_bn_silu_kernel(%arg0: i32, %arg1: i32, %arg2: i32, %arg3: memref<1x4x256xf32, #tpu.memory_space<vmem>>, %arg4: memref<8x4xf32, #tpu.memory_space<vmem>>, %arg5: memref<8x1xf32, #tpu.memory_space<vmem>>, %arg6: memref<1x8x256xf32, #tpu.memory_space<vmem>>) attributes {dimension_semantics = [#tpu.dimension_semantics<parallel>, #tpu.dimension_semantics<parallel>, #tpu.dimension_semantics<parallel>], iteration_bounds = array<i64: 2, 1, 1>, scalar_prefetch = 0 : i64, scratch_operands = 0 : i64, tpu.core_type = #tpu.core_type<tc>, window_params = [{transform_indices = @transform_0, window_bounds = array<i64: 1, 4, 256>}, {transform_indices = @transform_1, window_bounds = array<i64: 8, 4>}, {transform_indices = @transform_2, window_bounds = array<i64: 8, 1>}, {transform_indices = @transform_3, window_bounds = array<i64: 1, 8, 256>}]} {
    %c0 = arith.constant 0 : index
    %c0_0 = arith.constant 0 : index
    %0 = vector.load %arg4[%c0, %c0_0] : memref<8x4xf32, #tpu.memory_space<vmem>>, vector<8x4xf32>
    %c0_1 = arith.constant 0 : index
    %c0_2 = arith.constant 0 : index
    %c0_3 = arith.constant 0 : index
    %1 = vector.load %arg3[%c0_1, %c0_2, %c0_3] : memref<1x4x256xf32, #tpu.memory_space<vmem>>, vector<1x4x256xf32>
    %2 = vector.shape_cast %1 : vector<1x4x256xf32> to vector<4x256xf32>
    %cst = arith.constant dense<0.000000e+00> : vector<8x256xf32>
    %3 = tpu.matmul %0, %2, %cst {dimension_numbers = #tpu.dot_dimension_numbers<[1], [0], [0], [1], [0, 0, 1, 1], [], []>} : vector<8x4xf32>, vector<4x256xf32>, vector<8x256xf32> -> vector<8x256xf32>
    %c0_4 = arith.constant 0 : index
    %c0_5 = arith.constant 0 : index
    %4 = vector.load %arg5[%c0_4, %c0_5] : memref<8x1xf32, #tpu.memory_space<vmem>>, vector<8x1xf32>
    %5 = vector.broadcast %4 : vector<8x1xf32> to vector<8x256xf32>
    %6 = arith.addf %3, %5 : vector<8x256xf32>
    %cst_6 = arith.constant 0.000000e+00 : f32
    %7 = vector.broadcast %cst_6 : f32 to vector<8x256xf32>
    %8 = arith.subf %7, %6 : vector<8x256xf32>
    %9 = math.exp %8 : vector<8x256xf32>
    %cst_7 = arith.constant 1.000000e+00 : f32
    %10 = vector.broadcast %cst_7 : f32 to vector<8x256xf32>
    %11 = arith.addf %10, %9 : vector<8x256xf32>
    %cst_8 = arith.constant 1.000000e+00 : f32
    %12 = vector.broadcast %cst_8 : f32 to vector<8x256xf32>
    %13 = arith.divf %12, %11 : vector<8x256xf32>
    %14 = arith.mulf %6, %13 : vector<8x256xf32>
    %c0_9 = arith.constant 0 : index
    %c0_10 = arith.constant 0 : index
    %c0_11 = arith.constant 0 : index
    %15 = vector.load %arg6[%c0_9, %c0_10, %c0_11] : memref<1x8x256xf32, #tpu.memory_space<vmem>>, vector<1x8x256xf32>
    %16 = vector.shape_cast %15 : vector<1x8x256xf32> to vector<8x256xf32>
    %17 = vector.shape_cast %14 : vector<8x256xf32> to vector<1x8x256xf32>
    tpu.vector_store %arg6[%c0_9, %c0_10, %c0_11], %17 {strides = array<i32>} : memref<1x8x256xf32, #tpu.memory_space<vmem>>, vector<1x8x256xf32>,
    return
  }
  func.func @transform_0(%arg0: i32, %arg1: i32, %arg2: i32) -> (i32, i32, i32) {
    %c0_i32 = arith.constant 0 : i32
    %c0_i32_0 = arith.constant 0 : i32
    return %arg0, %c0_i32, %arg2 : i32, i32, i32
  }
  func.func @transform_1(%arg0: i32, %arg1: i32, %arg2: i32) -> (i32, i32) {
    %c0_i32 = arith.constant 0 : i32
    %c0_i32_0 = arith.constant 0 : i32
    return %arg1, %c0_i32 : i32, i32
  }
  func.func @transform_2(%arg0: i32, %arg1: i32, %arg2: i32) -> (i32, i32) {
    %c0_i32 = arith.constant 0 : i32
    %c0_i32_0 = arith.constant 0 : i32
    return %arg1, %c0_i32 : i32, i32
  }
  func.func @transform_3(%arg0: i32, %arg1: i32, %arg2: i32) -> (i32, i32, i32) {
    %c0_i32 = arith.constant 0 : i32
    return %arg0, %arg1, %arg2 : i32, i32, i32
  }
}

</mosaic_0001>

<bundles_post_ra>
// kernel: tpu_custom_call.1
= control target key start
LH: loop header
LB: loop body
LE: loop exit
PB: predicated region body
PF: predicated region fallthrough
CT: control target
= control target key end

     0   :  { %8 = vsyncpa [#allocation3], 0  ;;  %s787_s0 = inlined_call_operand.vmem [shape: f32[2,4,256], index: 0, kind: input, shape index: {}]   ;;  %s788_s1 = inlined_call_operand.vmem [shape: f32[8,4], index: 1, kind: input, shape index: {}]   ;;  %s789_s2 = inlined_call_operand.vmem [shape: f32[8,1], index: 2, kind: input, shape index: {}]   ;;  %s790_s3 = inlined_call_operand.hbm [shape: f32[2,8,256], index: 3, kind: output, shape index: {}]  }
   0x1   :  { %10 = vsyncpa [#allocation3 + $0x1], 0  ;;  %s669_s12 = smov 0   ;;  %s671_s13 = smov 0  }
   0x2   :  { %s673_s14 = smov 0   ;;  %s675_s15 = smov 0  }
   0x3   :  { %s677_s16 = smov 0   ;;  %s679_s17 = smov 0  }
   0x4 LB: > { %s479_s18 = sadd.s32 4294967295, %s644_s17   ;;  %s480_s19 = sadd.s32 4294967294, %s644_s17   ;;  %s644_s17 = sphi %s679_s17, %s16_s17   ;;  %s640_s16 = sphi %s677_s16, %s797_s16   ;;  %s636_s15 = sphi %s675_s15, %s796_s15   ;;  %s632_s14 = sphi %s673_s14, %s795_s14   ;;  %s628_s13 = sphi %s671_s13, %s794_s13   ;;  %s624_s12 = sphi %s669_s12, %s793_s12  }
   0x5   : > { %s35_s20 = sadd.s32 1, %s640_s16  ;;  %s126_s21 = sadd.s32 1, %s632_s14 }
   0x6   : > { %p37_p0 = scmp.ge.s32.totalorder %s35_s20, 2  ;;  %p136_p1 = scmp.ne.s32.totalorder %s632_s14, %s628_s13 }
   0x7   : > { %p137_p2 = scmp.eq.s32.totalorder %s479_s18, 1  ;;  %p142_p3 = scmp.ne.s32.totalorder %s628_s13, %s624_s12 }
   0x8   : > { %s799_s20 = smov (%p37_p0, %s35_s20), 0  ;;  %p143_p5 = scmp.eq.s32.totalorder %s480_s19, 1 }
   0x9   : > { %p709_p4 = por %p137_p2, %p136_p1  ;;  %s119_s23 = ssub.s32 %s640_s16, %s799_s20 }
   0xa   : > { %p485_p6 = scmp.ge.s32.totalorder %s644_s17, 1  ;;  %p124_p7 = scmp.eq.s32.totalorder %s119_s23, 0 }
   0xb   : > { %p716_p8 = por %p143_p5, %p142_p3  ;;  %p188_p9 = scmp.lt.s32.totalorder %s644_s17, 3 }
   0xc   : > { %s722_s25 = scalar_select %p124_p7, %s632_s14, %s126_s21  }
   0xd   : > { %p189_p10 = pnand %p485_p6, %p188_p9 }
   0xe   : > { %p225_p11 = scmp.lt.s32.totalorder (!%p189_p10), %s636_s15, 1  ;;  %v646_v0 = vmov (!%p189_p10), 0.0   ;;  %v647_v1 = vmov (!%p189_p10), 0   ;;  %v245_v2 = vld [vmem:[%s789_s2] sm:$0xff] (!%p189_p10)  ;;  %vm257_vm0 = vcmask (!%p189_p10), 1043456   ;;  %vm253_vm1 = vcmask (!%p189_p10), 31744  }
   0xf   : > { %192 = sbr.rel (%p189_p10) target bundleno = 290 (0x122), region = 32  ;;  %326 = vmatprep.mubr.f32.mxu0 (!%p189_p10), %v646_v0  ;;  %556 = vset.pattern.permute.xlu0 (!%p189_p10), %v647_v1  ;;  %v243_v5 = vld [vmem:[%s788_s1] sm:$0xff] (!%p189_p10)  ;;  %s221_s8 = sand.u32 (!%p189_p10), 1, %s628_s13  }
  0x10   : > { %248 = vperm.xlu0 (!%p189_p10), %556, %v245_v2   ;;  %s486_s9 = sshll.u32 (!%p189_p10), %s221_s8, 4  ;;  %s498_s10 = sshll.u32 (!%p189_p10), %s636_s15, 8 }
  0x11   : > { %s223_s11 = scalar_lea.vmem (!%p189_p10), [#allocation2], %s486_s9  ;;  %s740_s23 = scalar_lea.hbm (!%p189_p10), %s790_s3, %s498_s10 }
  0x12   : > { %s368_s18 = sshll.u32 (!%p189_p10), %s223_s11, 4  ;;  %s350_s26 = scalar_lea.sflag (!%p189_p10), [#allocation3], %s221_s8  ;;  %s742_s18 = int_to_ptr.vmem [resolvable:$true] %s368_s18 }
  0x13   : > { %s648_s27 = smov (!%p189_p10), [#allocation2]  }
  0x16   : > { %s226_s28 = scalar_select %p225_p11, %s636_s15, 1 }
  0x17   : > { %s566_s15 = scalar_lea.vmem %s742_s18, 256 }
  0x18   : > { %s497_s29 = sshll.u32 %s226_s28, 3  ;;  %p567_p12 = scmp.ne.s32.totalorder %s742_s18, %s566_s15 }
  0x19   : > { %s232_s5 = scalar_lea.vmem %s787_s0, %s497_s29  ;;  %s570_s28 = sshll.u32 %s648_s27, 4  ;;  %s571_s28 = int_to_ptr.vmem [resolvable:$false] %s570_s28 }
  0x1a   : > { %v244_v3 = vld [vmem:[%s232_s5] sm:$0xff]  ;;  %p568_p13 = pnand %p567_p12, %p709_p4  ;;  %s572_s29 = scalar_lea.vmem %s571_s28, 512 }
  0x1b   : > { %v252_v4 = vcombine.high %v244_v3, %v244_v3  ;;  %p573_p1 = scmp.lt.s32.totalorder %s742_s18, %s571_s28  ;;  %p574_p2 = scmp.lt.s32.totalorder %s572_s29, %s566_s15 }
  0x1c   : > { %p569_p0 = pneg %p568_p13 }
  0x1d   : > { %489 = vmatprep.subr.msk.mxu0 %vm257_vm0, %v252_v4  ;;  %p575_p3 = por %p574_p2, %p573_p1 }
  0x1e   : > { %490 = vmatpush1.msk.msra.mxu0 %vm257_vm0, %v244_v3 }
  0x1f   : > { %491 = vmatmul.mubr.msk.f32.vlgmr.msra.gmra.mrb[0].mxu0 %vm253_vm1, %v243_v5  ;;  %p576_p5 = pnand %p575_p3, %p569_p0 }
  0x8f   : > { %v249_v6 = vpop.permute.xlu0 %248 }
  0xf2   : > { %v328_v7 = vpop.f32.mrb[0].mxu0 }
  0xf3   : > { %v329_v8 = vadd.f32 %v328_v7, %v249_v6  ;;  %v330_v9 = vpop.f32.mrb[1].mxu0 }
  0xf4   : > { %v331_v10 = vadd.f32 %v330_v9, %v249_v6 }
  0xf5   : > { %v333_v11 = vsub.f32 0.0, %v329_v8 }
  0xf6   : > { %v334_v12 = vsub.f32 0.0, %v331_v10 }
  0xf7   : > { %v335_v13 = vmul.f32 1.442695, %v333_v11 }
  0xf8   : > { %v337_v14 = vmul.f32 1.442695, %v334_v12 }
  0xf9   : > { %558 = vpow2.f32 %v335_v13 }
  0xfa   : > { %560 = vpow2.f32 %v337_v14 }
 0x103   : > { %v559_v15 = vpop.eup %558 }
 0x104   : > { %v561_v16 = vpop.eup %560  ;;  %v339_v17 = vadd.f32 1.0, %v559_v15 }
 0x105   : > { %v340_v18 = vadd.f32 1.0, %v561_v16 }
 0x106   : > { %562 = vrcp.f32 %v339_v17 }
 0x107   : > { %564 = vrcp.f32 %v340_v18 }
 0x110   : > { %v563_v19 = vpop.eup %562 }
 0x111   : > { %v565_v20 = vpop.eup %564  ;;  %v345_v21 = vmul.f32 %v563_v19, %v329_v8 }
 0x112   : > { %v346_v22 = vmul.f32 %v565_v20, %v331_v10 }
 0x113   : > { %347 = vst [vmem:[%s223_s11] sm:$0xff] %v345_v21 }
 0x114   : > { %348 = vst [vmem:[%s223_s11 + $0x8] sm:$0xff] %v346_v22 }
 0x115   : > { %579 = shalt.err (!%p576_p5)
}
 0x116   : > { %s580_s30 = scalar_lea.hbm %s740_s23, 256  ;;  %s584_s6 = scalar_lea.hbm %s790_s3, 512 }
 0x117   : > { %p581_p6 = scmp.ne.s32.totalorder %s740_s23, %s580_s30  ;;  %p585_p10 = scmp.lt.u32.totalorder %s740_s23, %s790_s3 }
 0x118   : > { %p586_p11 = scmp.lt.u32.totalorder %s584_s6, %s580_s30  ;;  %p588_p13 = scmp.lt.u32.totalorder %s580_s30, %s740_s23 }
 0x119   : > { %p582_p7 = pnand %p581_p6, %p709_p4 }
 0x11a   : > { %p587_p12 = por %p586_p11, %p585_p10 }
 0x11b   : > { %p583_p9 = pneg %p582_p7 }
 0x11c   : > { %p589_p0 = por %p588_p13, %p587_p12 }
 0x11e   : > { %p590_p1 = pnand %p589_p0, %p583_p9 }
 0x120   : > { %593 = shalt.err (!%p590_p1)
}
 0x121   : > { %499 = dma.vmem_to_hbm [thread:$0]  (%p709_p4), %s742_s18, 256, %s740_s23, %s350_s26  }
 0x122 PF: > { %p505_p2 = scmp.ge.s32.totalorder %s644_s17, 2  ;;  %s380_s9 = sand.u32 1, %s624_s12  }
 0x123   : > { %s381_s10 = scalar_lea.sflag [#allocation3], %s380_s9 }
 0x124   : > { %p502_p3 = pnand %p505_p2, %p716_p8 }
 0x126   : > { %619 = dma.done.wait (!%p502_p3), %s381_s10, 256  }
 0x127   : > { %621 = vsyncadd (!%p502_p3), %s381_s10, 4294967040  ;;  %s16_s17 = sadd.s32 1, %s644_s17   ;;  %s793_s12 = smov %s628_s13 }
 0x128   : > { %p13_p5 = scmp.ge.s32.totalorder %s16_s17, 4   ;;  %s794_s13 = smov %s632_s14 }
 0x129   : > { %s795_s14 = smov %s722_s25  ;;  %s796_s15 = smov %s640_s16 }
 0x12a   : > { %s797_s16 = smov %s799_s20  ;;  %15 = sbr.rel (!%p13_p5) target bundleno = 4 (0x4), region = 73 }
 0x131   :  { %386 = vsyncpa [#allocation3], 1 }
 0x132   :  { %388 = vsyncpa [#allocation3 + $0x1], 1 }

// kernel: tpu_custom_call.1
= control target key start
LH: loop header
LB: loop body
LE: loop exit
PB: predicated region body
PF: predicated region fallthrough
CT: control target
= control target key end

     0   :  { %8 = vsyncpa [#allocation3], 0  ;;  %s787_s0 = inlined_call_operand.vmem [shape: f32[2,4,256], index: 0, kind: input, shape index: {}]   ;;  %s788_s1 = inlined_call_operand.vmem [shape: f32[8,4], index: 1, kind: input, shape index: {}]   ;;  %s789_s2 = inlined_call_operand.vmem [shape: f32[8,1], index: 2, kind: input, shape index: {}]   ;;  %s790_s3 = inlined_call_operand.hbm [shape: f32[2,8,256], index: 3, kind: output, shape index: {}]  }
   0x1   :  { %10 = vsyncpa [#allocation3 + $0x1], 0  ;;  %s669_s12 = smov 0   ;;  %s671_s13 = smov 0  }
   0x2   :  { %s673_s14 = smov 0   ;;  %s675_s15 = smov 0  }
   0x3   :  { %s677_s16 = smov 0   ;;  %s679_s17 = smov 0  }
   0x4 LB: > { %s479_s18 = sadd.s32 4294967295, %s644_s17   ;;  %s480_s19 = sadd.s32 4294967294, %s644_s17   ;;  %s644_s17 = sphi %s679_s17, %s16_s17   ;;  %s640_s16 = sphi %s677_s16, %s797_s16   ;;  %s636_s15 = sphi %s675_s15, %s796_s15   ;;  %s632_s14 = sphi %s673_s14, %s795_s14   ;;  %s628_s13 = sphi %s671_s13, %s794_s13   ;;  %s624_s12 = sphi %s669_s12, %s793_s12  }
   0x5   : > { %s35_s20 = sadd.s32 1, %s640_s16  ;;  %s126_s21 = sadd.s32 1, %s632_s14 }
   0x6   : > { %p37_p0 = scmp.ge.s32.totalorder %s35_s20, 2  ;;  %p136_p1 = scmp.ne.s32.totalorder %s632_s14, %s628_s13 }
   0x7   : > { %p137_p2 = scmp.eq.s32.totalorder %s479_s18, 1  ;;  %p142_p3 = scmp.ne.s32.totalorder %s628_s13, %s624_s12 }
   0x8   : > { %s799_s20 = smov (%p37_p0, %s35_s20), 0  ;;  %p143_p5 = scmp.eq.s32.totalorder %s480_s19, 1 }
   0x9   : > { %p709_p4 = por %p137_p2, %p136_p1  ;;  %s119_s23 = ssub.s32 %s640_s16, %s799_s20 }
   0xa   : > { %p485_p6 = scmp.ge.s32.totalorder %s644_s17, 1  ;;  %p124_p7 = scmp.eq.s32.totalorder %s119_s23, 0 }
   0xb   : > { %p716_p8 = por %p143_p5, %p142_p3  ;;  %p188_p9 = scmp.lt.s32.totalorder %s644_s17, 3 }
   0xc   : > { %s722_s25 = scalar_select %p124_p7, %s632_s14, %s126_s21  }
   0xd   : > { %p189_p10 = pnand %p485_p6, %p188_p9 }
   0xe   : > { %p225_p11 = scmp.lt.s32.totalorder (!%p189_p10), %s636_s15, 1  ;;  %v646_v0 = vmov (!%p189_p10), 0.0   ;;  %v647_v1 = vmov (!%p189_p10), 0   ;;  %v245_v2 = vld [vmem:[%s789_s2] sm:$0xff] (!%p189_p10)  ;;  %vm257_vm0 = vcmask (!%p189_p10), 1043456   ;;  %vm253_vm1 = vcmask (!%p189_p10), 31744  }
   0xf   : > { %192 = sbr.rel (%p189_p10) target bundleno = 290 (0x122), region = 32  ;;  %326 = vmatprep.mubr.f32.mxu0 (!%p189_p10), %v646_v0  ;;  %556 = vset.pattern.permute.xlu0 (!%p189_p10), %v647_v1  ;;  %v243_v5 = vld [vmem:[%s788_s1] sm:$0xff] (!%p189_p10)  ;;  %s221_s8 = sand.u32 (!%p189_p10), 1, %s628_s13  }
  0x10   : > { %248 = vperm.xlu0 (!%p189_p10), %556, %v245_v2   ;;  %s486_s9 = sshll.u32 (!%p189_p10), %s221_s8, 4  ;;  %s498_s10 = sshll.u32 (!%p189_p10), %s636_s15, 8 }
  0x11   : > { %s223_s11 = scalar_lea.vmem (!%p189_p10), [#allocation2], %s486_s9  ;;  %s740_s23 = scalar_lea.hbm (!%p189_p10), %s790_s3, %s498_s10 }
  0x12   : > { %s368_s18 = sshll.u32 (!%p189_p10), %s223_s11, 4  ;;  %s350_s26 = scalar_lea.sflag (!%p189_p10), [#allocation3], %s221_s8  ;;  %s742_s18 = int_to_ptr.vmem [resolvable:$true] %s368_s18 }
  0x13   : > { %s648_s27 = smov (!%p189_p10), [#allocation2]  }
  0x16   : > { %s226_s28 = scalar_select %p225_p11, %s636_s15, 1 }
  0x17   : > { %s566_s15 = scalar_lea.vmem %s742_s18, 256 }
  0x18   : > { %s497_s29 = sshll.u32 %s226_s28, 3  ;;  %p567_p12 = scmp.ne.s32.totalorder %s742_s18, %s566_s15 }
  0x19   : > { %s232_s5 = scalar_lea.vmem %s787_s0, %s497_s29  ;;  %s570_s28 = sshll.u32 %s648_s27, 4  ;;  %s571_s28 = int_to_ptr.vmem [resolvable:$false] %s570_s28 }
  0x1a   : > { %v244_v3 = vld [vmem:[%s232_s5] sm:$0xff]  ;;  %p568_p13 = pnand %p567_p12, %p709_p4  ;;  %s572_s29 = scalar_lea.vmem %s571_s28, 512 }
  0x1b   : > { %v252_v4 = vcombine.high %v244_v3, %v244_v3  ;;  %p573_p1 = scmp.lt.s32.totalorder %s742_s18, %s571_s28  ;;  %p574_p2 = scmp.lt.s32.totalorder %s572_s29, %s566_s15 }
  0x1c   : > { %p569_p0 = pneg %p568_p13 }
  0x1d   : > { %489 = vmatprep.subr.msk.mxu0 %vm257_vm0, %v252_v4  ;;  %p575_p3 = por %p574_p2, %p573_p1 }
  0x1e   : > { %490 = vmatpush1.msk.msra.mxu0 %vm257_vm0, %v244_v3 }
  0x1f   : > { %491 = vmatmul.mubr.msk.f32.vlgmr.msra.gmra.mrb[0].mxu0 %vm253_vm1, %v243_v5  ;;  %p576_p5 = pnand %p575_p3, %p569_p0 }
  0x8f   : > { %v249_v6 = vpop.permute.xlu0 %248 }
  0xf2   : > { %v328_v7 = vpop.f32.mrb[0].mxu0 }
  0xf3   : > { %v329_v8 = vadd.f32 %v328_v7, %v249_v6  ;;  %v330_v9 = vpop.f32.mrb[1].mxu0 }
  0xf4   : > { %v331_v10 = vadd.f32 %v330_v9, %v249_v6 }
  0xf5   : > { %v333_v11 = vsub.f32 0.0, %v329_v8 }
  0xf6   : > { %v334_v12 = vsub.f32 0.0, %v331_v10 }
  0xf7   : > { %v335_v13 = vmul.f32 1.442695, %v333_v11 }
  0xf8   : > { %v337_v14 = vmul.f32 1.442695, %v334_v12 }
  0xf9   : > { %558 = vpow2.f32 %v335_v13 }
  0xfa   : > { %560 = vpow2.f32 %v337_v14 }
 0x103   : > { %v559_v15 = vpop.eup %558 }
 0x104   : > { %v561_v16 = vpop.eup %560  ;;  %v339_v17 = vadd.f32 1.0, %v559_v15 }
 0x105   : > { %v340_v18 = vadd.f32 1.0, %v561_v16 }
 0x106   : > { %562 = vrcp.f32 %v339_v17 }
 0x107   : > { %564 = vrcp.f32 %v340_v18 }
 0x110   : > { %v563_v19 = vpop.eup %562 }
 0x111   : > { %v565_v20 = vpop.eup %564  ;;  %v345_v21 = vmul.f32 %v563_v19, %v329_v8 }
 0x112   : > { %v346_v22 = vmul.f32 %v565_v20, %v331_v10 }
 0x113   : > { %347 = vst [vmem:[%s223_s11] sm:$0xff] %v345_v21 }
 0x114   : > { %348 = vst [vmem:[%s223_s11 + $0x8] sm:$0xff] %v346_v22 }
 0x115   : > { %579 = shalt.err (!%p576_p5)
}
 0x116   : > { %s580_s30 = scalar_lea.hbm %s740_s23, 256  ;;  %s584_s6 = scalar_lea.hbm %s790_s3, 512 }
 0x117   : > { %p581_p6 = scmp.ne.s32.totalorder %s740_s23, %s580_s30  ;;  %p585_p10 = scmp.lt.u32.totalorder %s740_s23, %s790_s3 }
 0x118   : > { %p586_p11 = scmp.lt.u32.totalorder %s584_s6, %s580_s30  ;;  %p588_p13 = scmp.lt.u32.totalorder %s580_s30, %s740_s23 }
 0x119   : > { %p582_p7 = pnand %p581_p6, %p709_p4 }
 0x11a   : > { %p587_p12 = por %p586_p11, %p585_p10 }
 0x11b   : > { %p583_p9 = pneg %p582_p7 }
 0x11c   : > { %p589_p0 = por %p588_p13, %p587_p12 }
 0x11e   : > { %p590_p1 = pnand %p589_p0, %p583_p9 }
 0x120   : > { %593 = shalt.err (!%p590_p1)
}
 0x121   : > { %499 = dma.vmem_to_hbm [thread:$0]  (%p709_p4), %s742_s18, 256, %s740_s23, %s350_s26  }
 0x122 PF: > { %p505_p2 = scmp.ge.s32.totalorder %s644_s17, 2  ;;  %s380_s9 = sand.u32 1, %s624_s12  }
 0x123   : > { %s381_s10 = scalar_lea.sflag [#allocation3], %s380_s9 }
 0x124   : > { %p502_p3 = pnand %p505_p2, %p716_p8 }
 0x126   : > { %619 = dma.done.wait (!%p502_p3), %s381_s10, 256  }
 0x127   : > { %621 = vsyncadd (!%p502_p3), %s381_s10, 4294967040  ;;  %s16_s17 = sadd.s32 1, %s644_s17   ;;  %s793_s12 = smov %s628_s13 }
 0x128   : > { %p13_p5 = scmp.ge.s32.totalorder %s16_s17, 4   ;;  %s794_s13 = smov %s632_s14 }
 0x129   : > { %s795_s14 = smov %s722_s25  ;;  %s796_s15 = smov %s640_s16 }
 0x12a   : > { %s797_s16 = smov %s799_s20  ;;  %15 = sbr.rel (!%p13_p5) target bundleno = 4 (0x4), region = 73 }
 0x131   :  { %386 = vsyncpa [#allocation3], 1 }
 0x132   :  { %388 = vsyncpa [#allocation3 + $0x1], 1 }

</bundles_post_ra>
